<compile_context>
chip_gen: v7x
topology: tpu7x:2x2x1
jax: 0.10.0
libtpu: 0.0.40
codegen_flags: <defaults>
</compile_context>

<pallas_src>
import functools

import jax
import jax.numpy as jnp
from jax import lax
from jax.experimental import pallas as pl
from jax.experimental.pallas import tpu as pltpu

BN_EPS = 1e-5
_LANE = 128
_SUBLANE = 8


def _round_up(x, m):
    return (x + m - 1) // m * m


def _elu(x):
    # ELU(alpha=1): x for x > 0 else exp(x) - 1 (expm1 = accurate near 0).
    return jnp.where(x > 0, x, jnp.expm1(x))


def _partial_stats(h, n_true, tile):
    """Masked per-tile sum / sum-of-squares over the batch (sublane) axis.

    Done with a ones-row matmul on the MXU instead of a cross-sublane XLU
    reduction.  Returns an (8, C) slab: row0 = sum, row1 = sumsq, rows 2..7 = 0.
    """
    base = pl.program_id(0) * tile
    row_idx = base + lax.broadcasted_iota(jnp.int32, (1, tile), 1)
    mask = (row_idx < n_true).astype(jnp.float32)                      # (1, T)
    sums = jnp.dot(mask, h, preferred_element_type=jnp.float32)        # (1, C)
    sumsq = jnp.dot(mask, h * h, preferred_element_type=jnp.float32)   # (1, C)
    pad = jnp.zeros((_SUBLANE - 2, h.shape[1]), jnp.float32)
    return jnp.concatenate([sums, sumsq, pad], axis=0)


# ---------------------------------------------------------------- kernels ----
def _layer1_kernel(n_true, tile, x_ref, w_ref, b_ref, h_ref, s_ref):
    # h1 = x @ W1 + b1      (bf16 operands, f32 accumulation)
    h = jnp.dot(x_ref[...].astype(jnp.bfloat16), w_ref[...],
                preferred_element_type=jnp.float32) + b_ref[...]
    h_ref[...] = h
    s_ref[0] = _partial_stats(h, n_true, tile)


def _bn_linear_kernel(n_true, tile, h_ref, sc_ref, sh_ref, w_ref, b_ref,
                      o_ref, s_ref):
    # a = ELU(BN(h));  o = a @ W + b   (+ partial stats for the next BN)
    a = _elu(h_ref[...] * sc_ref[...] + sh_ref[...])
    o = jnp.dot(a.astype(jnp.bfloat16), w_ref[...],
                preferred_element_type=jnp.float32) + b_ref[...]
    o_ref[...] = o
    s_ref[0] = _partial_stats(o, n_true, tile)


def _bn_final_kernel(h_ref, sc_ref, sh_ref, w_ref, b_ref, o_ref):
    a = _elu(h_ref[...] * sc_ref[...] + sh_ref[...])
    o_ref[...] = jnp.dot(a.astype(jnp.bfloat16), w_ref[...],
                         preferred_element_type=jnp.float32) + b_ref[...]


# ---------------------------------------------------------------- wrapper ----
def _bn_scale_shift(stats, n_true, gamma, beta):
    """Reduce per-tile (sum, sumsq) partials into a fused BN scale/shift."""
    sums = jnp.sum(stats[:, 0, :], axis=0)
    sumsq = jnp.sum(stats[:, 1, :], axis=0)
    mean = sums / n_true
    var = jnp.maximum(sumsq / n_true - mean * mean, 0.0)   # biased variance
    scale = gamma * lax.rsqrt(var + BN_EPS)                # (1, C)
    shift = beta - mean * scale                            # (1, C)
    return scale, shift


def encoder_forward(x, params, z, *, tile_n=256):
    """x: (N, ze) float32.  Returns (w1, w2, w3), each ((N*2*z)//(3*z), z)."""
    N, ze = x.shape
    (w1, b1, g1, be1, w2, b2, g2, be2, w3, b3) = params

    tile = _round_up(min(tile_n, _round_up(N, _SUBLANE)), _SUBLANE)
    nt = pl.cdiv(N, tile)
    n_pad = nt * tile

    x = x.astype(jnp.float32)
    if n_pad != N:
        x = jnp.pad(x, ((0, n_pad - N), (0, 0)))   # padded rows masked in stats

    # bf16 weights (MXU-native); biases / BN affine stay f32.
    w1b = w1.astype(jnp.bfloat16)
    w2b = w2.astype(jnp.bfloat16)
    out_dim = w3.shape[1]                    # 2 * z
    out_pad = _round_up(out_dim, _LANE)      # lane-dense final store
    w3p = jnp.zeros((w3.shape[0], out_pad), jnp.bfloat16)
    w3p = w3p.at[:, :out_dim].set(w3.astype(jnp.bfloat16))
    b3p = jnp.zeros((1, out_pad), jnp.float32).at[:, :out_dim].set(b3)

    cp = pltpu.CompilerParams(dimension_semantics=("parallel",),
                              vmem_limit_bytes=32 * 1024 * 1024)

    def tiled(c):
        return pl.BlockSpec((tile, c), lambda i: (i, 0))

    def resident(shape):
        ndim = len(shape)
        return pl.BlockSpec(shape, lambda i: (0,) * ndim)

    def stats_spec(c):
        return pl.BlockSpec((1, _SUBLANE, c), lambda i: (i, 0, 0))

    # ---- pass 1: h1 = x @ W1 + b1  (+ masked batch sum/sumsq) ---------------
    h1, s1 = pl.pallas_call(
        functools.partial(_layer1_kernel, N, tile),
        grid=(nt,),
        in_specs=[tiled(ze), resident(w1b.shape), resident(b1.shape)],
        out_specs=[tiled(256), stats_spec(256)],
        out_shape=[jax.ShapeDtypeStruct((n_pad, 256), jnp.float32),
                   jax.ShapeDtypeStruct((nt, _SUBLANE, 256), jnp.float32)],
        compiler_params=cp,
    )(x, w1b, b1)
    sc1, sh1 = _bn_scale_shift(s1, N, g1, be1)

    # ---- pass 2: h2 = ELU(BN1(h1)) @ W2 + b2  (+ stats) ---------------------
    h2, s2 = pl.pallas_call(
        functools.partial(_bn_linear_kernel, N, tile),
        grid=(nt,),
        in_specs=[tiled(256), resident(sc1.shape), resident(sh1.shape),
                  resident(w2b.shape), resident(b2.shape)],
        out_specs=[tiled(128), stats_spec(128)],
        out_shape=[jax.ShapeDtypeStruct((n_pad, 128), jnp.float32),
                   jax.ShapeDtypeStruct((nt, _SUBLANE, 128), jnp.float32)],
        compiler_params=cp,
    )(h1, sc1, sh1, w2b, b2)
    sc2, sh2 = _bn_scale_shift(s2, N, g2, be2)

    # ---- pass 3: y = ELU(BN2(h2)) @ W3 + b3  (lane-dense padded output) -----
    y = pl.pallas_call(
        _bn_final_kernel,
        grid=(nt,),
        in_specs=[tiled(128), resident(sc2.shape), resident(sh2.shape),
                  resident(w3p.shape), resident(b3p.shape)],
        out_specs=tiled(out_pad),
        out_shape=jax.ShapeDtypeStruct((n_pad, out_pad), jnp.float32),
        compiler_params=cp,
    )(h2, sc2, sh2, w3p, b3p)

    y = y[:N, :out_dim]
    y3 = y.reshape(-1, 3, z)          # matches PyTorch x.view(-1, 3, self.z)
    return y3[:, 0], y3[:, 1], y3[:, 2]


# ------------------------------------------------------------- reference -----
def _reference_forward(x, params, z):
    """Pure-JAX f32 reference with PyTorch BatchNorm1d training semantics."""
    (w1, b1, g1, be1, w2, b2, g2, be2, w3, b3) = params

    def bn(h, g, b):
        mean = jnp.mean(h, axis=0, keepdims=True)
        var = jnp.mean((h - mean) ** 2, axis=0, keepdims=True)
        return (h - mean) * lax.rsqrt(var + BN_EPS) * g + b

    h = _elu(bn(x @ w1 + b1, g1, be1))
    h = _elu(bn(h @ w2 + b2, g2, be2))
    y = h @ w3 + b3
    y3 = y.reshape(-1, 3, z)
    return y3[:, 0], y3[:, 1], y3[:, 2]


def init_params(key, ze, z):
    """Deterministic init mirroring PyTorch defaults (uniform(+-1/sqrt(fan_in))
    for Linear, ones/zeros for BatchNorm affine). Weights stored as (in, out)."""
    dims = [(ze, 256), (256, 128), (128, 2 * z)]
    params = []
    keys = jax.random.split(key, 6)
    ki = 0
    for li, (fan_in, fan_out) in enumerate(dims):
        bound = 1.0 / jnp.sqrt(fan_in)
        w = jax.random.uniform(keys[ki], (fan_in, fan_out), jnp.float32, -bound, bound)
        ki += 1
        b = jax.random.uniform(keys[ki], (1, fan_out), jnp.float32, -bound, bound)
        ki += 1
        params += [w, b]
        if li < 2:  # bn1 / bn2 affine params
            params += [jnp.ones((1, fan_out), jnp.float32),
                       jnp.zeros((1, fan_out), jnp.float32)]
    return tuple(params)


if __name__ == "__main__":
    ze = 32   # input feature size
    z = 16    # latent size; linear3 outputs 2*z = 32
    N = 6     # batch; N*2*z must be divisible by 3*z for the view(-1, 3, z)
    # Note: at N=6 the grid is a single 8-row tile (pure overhead regime);
    # the same code scales to large N with 256-row tiles and constant VMEM.

    key = jax.random.PRNGKey(0)
    k_x, k_p = jax.random.split(key)
    x = jax.random.normal(k_x, (N, ze), dtype=jnp.float32)
    params = init_params(k_p, ze, z)

    outs = encoder_forward(x, params, z)
    jax.block_until_ready(outs)
    w1_out, w2_out, w3_out = outs

    expected_rows = (N * 2 * z) // (3 * z)
    assert w1_out.shape == (expected_rows, z)
    assert w2_out.shape == (expected_rows, z)
    assert w3_out.shape == (expected_rows, z)

    # Tolerances account for bf16 matmul operands (f32 accumulation).
    refs = _reference_forward(x, params, z)
    for got, ref in zip(outs, refs):
        assert bool(jnp.allclose(got, ref, atol=5e-2, rtol=5e-2)), (
            "mismatch vs f32 reference")

    print("KERNEL_OK")
</pallas_src>

<mosaic_0001>
module attributes {stable_mosaic.version = 11 : i64} {
  func.func @_layer1_kernel(%arg0: i32, %arg1: memref<8x32xf32, #tpu.memory_space<vmem>>, %arg2: memref<32x256xbf16, #tpu.memory_space<vmem>>, %arg3: memref<1x256xf32, #tpu.memory_space<vmem>>, %arg4: memref<8x256xf32, #tpu.memory_space<vmem>>, %arg5: memref<1x8x256xf32, #tpu.memory_space<vmem>>) attributes {dimension_semantics = [#tpu.dimension_semantics<parallel>], iteration_bounds = array<i64: 1>, scalar_prefetch = 0 : i64, scratch_operands = 0 : i64, tpu.core_type = #tpu.core_type<tc>, window_params = [{transform_indices = @transform_0, window_bounds = array<i64: 8, 32>}, {pipeline_mode = #tpu.pipeline_mode<synchronous>, transform_indices = @transform_1, window_bounds = array<i64: 32, 256>}, {pipeline_mode = #tpu.pipeline_mode<synchronous>, transform_indices = @transform_2, window_bounds = array<i64: 1, 256>}, {transform_indices = @transform_3, window_bounds = array<i64: 8, 256>}, {transform_indices = @transform_4, window_bounds = array<i64: 1, 8, 256>}]} {
    %c0 = arith.constant 0 : index
    %c0_0 = arith.constant 0 : index
    %0 = vector.load %arg1[%c0, %c0_0] : memref<8x32xf32, #tpu.memory_space<vmem>>, vector<8x32xf32>
    %1 = arith.truncf %0 : vector<8x32xf32> to vector<8x32xbf16>
    %c0_1 = arith.constant 0 : index
    %c0_2 = arith.constant 0 : index
    %2 = vector.load %arg2[%c0_1, %c0_2] : memref<32x256xbf16, #tpu.memory_space<vmem>>, vector<32x256xbf16>
    %cst = arith.constant dense<0.000000e+00> : vector<8x256xf32>
    %3 = tpu.matmul %1, %2, %cst {dimension_numbers = #tpu.dot_dimension_numbers<[1], [0], [0], [1], [0, 0, 1, 1], [], []>} : vector<8x32xbf16>, vector<32x256xbf16>, vector<8x256xf32> -> vector<8x256xf32>
    %c0_3 = arith.constant 0 : index
    %c0_4 = arith.constant 0 : index
    %4 = vector.load %arg3[%c0_3, %c0_4] : memref<1x256xf32, #tpu.memory_space<vmem>>, vector<1x256xf32>
    %5 = vector.broadcast %4 : vector<1x256xf32> to vector<8x256xf32>
    %6 = arith.addf %3, %5 : vector<8x256xf32>
    %c0_5 = arith.constant 0 : index
    %c0_6 = arith.constant 0 : index
    %7 = vector.load %arg4[%c0_5, %c0_6] : memref<8x256xf32, #tpu.memory_space<vmem>>, vector<8x256xf32>
    tpu.vector_store %arg4[%c0_5, %c0_6], %6 {strides = array<i32>} : memref<8x256xf32, #tpu.memory_space<vmem>>, vector<8x256xf32>,
    %c8_i32 = arith.constant 8 : i32
    %8 = arith.muli %arg0, %c8_i32 : i32
    %9 = tpu.iota {dimensions = array<i32: 1>} : vector<1x8xi32>
    %10 = vector.broadcast %8 : i32 to vector<1x8xi32>
    %11 = arith.addi %10, %9 : vector<1x8xi32>
    %c6_i32 = arith.constant 6 : i32
    %12 = vector.broadcast %c6_i32 : i32 to vector<1x8xi32>
    %13 = arith.cmpi slt, %11, %12 : vector<1x8xi32>
    %14 = arith.extui %13 : vector<1x8xi1> to vector<1x8xi32>
    %15 = arith.sitofp %14 : vector<1x8xi32> to vector<1x8xf32>
    %cst_7 = arith.constant dense<0.000000e+00> : vector<1x256xf32>
    %16 = tpu.matmul %15, %6, %cst_7 {dimension_numbers = #tpu.dot_dimension_numbers<[1], [0], [0], [1], [0, 0, 1, 1], [], []>} : vector<1x8xf32>, vector<8x256xf32>, vector<1x256xf32> -> vector<1x256xf32>
    %17 = arith.mulf %6, %6 : vector<8x256xf32>
    %cst_8 = arith.constant dense<0.000000e+00> : vector<1x256xf32>
    %18 = tpu.matmul %15, %17, %cst_8 {dimension_numbers = #tpu.dot_dimension_numbers<[1], [0], [0], [1], [0, 0, 1, 1], [], []>} : vector<1x8xf32>, vector<8x256xf32>, vector<1x256xf32> -> vector<1x256xf32>
    %cst_9 = arith.constant 0.000000e+00 : f32
    %19 = vector.broadcast %cst_9 : f32 to vector<6x256xf32>
    %20 = tpu.concatenate %16, %18, %19 in 0 : vector<1x256xf32>, vector<1x256xf32>, vector<6x256xf32> -> vector<8x256xf32>
    %c0_10 = arith.constant 0 : index
    %c0_11 = arith.constant 0 : index
    %c0_12 = arith.constant 0 : index
    %21 = vector.load %arg5[%c0_10, %c0_11, %c0_12] : memref<1x8x256xf32, #tpu.memory_space<vmem>>, vector<1x8x256xf32>
    %22 = vector.shape_cast %21 : vector<1x8x256xf32> to vector<8x256xf32>
    %23 = vector.shape_cast %20 : vector<8x256xf32> to vector<1x8x256xf32>
    tpu.vector_store %arg5[%c0_10, %c0_11, %c0_12], %23 {strides = array<i32>} : memref<1x8x256xf32, #tpu.memory_space<vmem>>, vector<1x8x256xf32>,
    return
  }
  func.func @transform_0(%arg0: i32) -> (i32, i32) {
    %c0_i32 = arith.constant 0 : i32
    %c0_i32_0 = arith.constant 0 : i32
    return %arg0, %c0_i32 : i32, i32
  }
  func.func @transform_1(%arg0: i32) -> (i32, i32) {
    %c0_i32 = arith.constant 0 : i32
    %c0_i32_0 = arith.constant 0 : i32
    %c0_i32_1 = arith.constant 0 : i32
    return %c0_i32, %c0_i32_0 : i32, i32
  }
  func.func @transform_2(%arg0: i32) -> (i32, i32) {
    %c0_i32 = arith.constant 0 : i32
    %c0_i32_0 = arith.constant 0 : i32
    %c0_i32_1 = arith.constant 0 : i32
    return %c0_i32, %c0_i32_0 : i32, i32
  }
  func.func @transform_3(%arg0: i32) -> (i32, i32) {
    %c0_i32 = arith.constant 0 : i32
    %c0_i32_0 = arith.constant 0 : i32
    return %arg0, %c0_i32 : i32, i32
  }
  func.func @transform_4(%arg0: i32) -> (i32, i32, i32) {
    %c0_i32 = arith.constant 0 : i32
    %c0_i32_0 = arith.constant 0 : i32
    %c0_i32_1 = arith.constant 0 : i32
    return %arg0, %c0_i32, %c0_i32_0 : i32, i32, i32
  }
}

</mosaic_0001>

<bundles_post_ra>
// kernel: tpu_custom_call.1
= control target key start
LH: loop header
LB: loop body
LE: loop exit
PB: predicated region body
PF: predicated region fallthrough
CT: control target
= control target key end

     0   :  { %10 = vsyncpa [#allocation3], 0  ;;  %s539_s0 = inlined_call_operand.hbm [shape: f32[8,32], index: 0, kind: input, shape index: {}]   ;;  %s540_s1 = inlined_call_operand.hbm [shape: bf16[32,256], index: 1, kind: input, shape index: {}]   ;;  %s541_s2 = inlined_call_operand.vmem [shape: f32[1,256], index: 2, kind: input, shape index: {}]   ;;  %s542_s3 = inlined_call_operand.hbm [shape: f32[8,256], index: 3, kind: output, shape index: {0}]   ;;  %s543_s4 = inlined_call_operand.hbm [shape: f32[1,8,256], index: 4, kind: output, shape index: {1}]  }
   0x1   :  { %11 = vsyncpa [#allocation6], 0 }
   0x2   :  { %12 = vsyncpa [#allocation4], 0 }
   0x3   :  { %13 = vsyncpa [#allocation9], 0  ;;  %s448_s15 = smov [#allocation2]   ;;  %s449_s17 = smov [#allocation5]  }
   0x4   :  { %s20_s16 = sshll.u32 %s448_s15, 4  ;;  %s29_s18 = sshll.u32 %s449_s17, 4  ;;  %s21_s16 = int_to_ptr.vmem [resolvable:$true] %s20_s16  ;;  %s481_s18 = int_to_ptr.vmem [resolvable:$true] %s29_s18 }
   0x5   :  { %s352_s21 = scalar_lea.hbm %s539_s0, 128 }
   0x6   :  { %p353_p0 = scmp.ne.s32.totalorder %s539_s0, %s352_s21  ;;  %p356_p1 = scmp.lt.u32.totalorder %s352_s21, %s539_s0 }
   0x8   :  { %p358_p2 = pnand %p356_p1, %p353_p0 }
   0xa   :  { %361 = shalt.err (!%p358_p2)
}
   0xb   :  { %s362_s26 = scalar_lea.vmem %s21_s16, 128  ;;  %p367_p4 = scmp.lt.s32.totalorder %s21_s16, %s21_s16 }
   0xc   :  { %p363_p3 = scmp.ne.s32.totalorder %s21_s16, %s362_s26  ;;  %p368_p5 = scmp.lt.s32.totalorder %s362_s26, %s362_s26 }
   0xe   :  { %p369_p6 = por %p368_p5, %p367_p4 }
  0x10   :  { %p370_p7 = pnand %p369_p6, %p363_p3 }
  0x12   :  { %373 = shalt.err (!%p370_p7)
}
  0x13   :  { %23 = dma.hbm_to_vmem [thread:$0]  %s539_s0, 128, %s21_s16, [#allocation3]  }
  0x14   :  { %s374_s5 = scalar_lea.hbm %s540_s1, 512 }
  0x15   :  { %p375_p8 = scmp.ne.s32.totalorder %s540_s1, %s374_s5  ;;  %p378_p9 = scmp.lt.u32.totalorder %s374_s5, %s540_s1 }
  0x17   :  { %p380_p10 = pnand %p378_p9, %p375_p8 }
  0x19   :  { %383 = shalt.err (!%p380_p10)
}
  0x1a   :  { %s384_s10 = scalar_lea.vmem %s481_s18, 512  ;;  %p389_p12 = scmp.lt.s32.totalorder %s481_s18, %s481_s18 }
  0x1b   :  { %p385_p11 = scmp.ne.s32.totalorder %s481_s18, %s384_s10  ;;  %p390_p13 = scmp.lt.s32.totalorder %s384_s10, %s384_s10 }
  0x1d   :  { %p391_p0 = por %p390_p13, %p389_p12 }
  0x1f   :  { %p392_p1 = pnand %p391_p0, %p385_p11 }
  0x21   :  { %395 = shalt.err (!%p392_p1)
}
  0x22   :  { %s450_s0 = smov 128   ;;  %s451_s11 = smov 8  }
  0x23   :  { %35 = dma.hbm_to_vmem [thread:$0]  %s540_s1, 512, %s481_s18, [#allocation6], %s450_s0, %s450_s0, %s451_s11  }
  0x24   :  { %440 = dma.done.wait [#allocation3], 128  }
  0x25   :  { %441 = vsyncadd [#allocation3], 4294967168 }
  0x26   :  { %442 = dma.done.wait [#allocation6], 512  }
  0x27   :  { %443 = vsyncadd [#allocation6], 4294966784  ;;  %v452_v0 = vmov 0   ;;  %v346_v1 = vld [vmem:[#allocation5 + $0x4] ss:$8 sps:$4 sm:$0xff]   ;;  %v45_v5 = vld [vmem:[#allocation2] sm:$0xff]  ;;  %v53_v8 = vlaneseq }
  0x28   :  { %119 = vmatprep.mubr.bf16.mxu0 %v452_v0  ;;  %v348_v2 = vld [vmem:[#allocation5] ss:$8 sps:$4 sm:$0xff]   ;;  %87 = vmatprep.subr.bf16.mxu0 %v346_v1  ;;  %v349_v3 = vld [vmem:[#allocation5 + $0x14] ss:$8 sps:$4 sm:$0xff]   ;;  %v351_v4 = vld [vmem:[#allocation5 + $0x10] ss:$8 sps:$4 sm:$0xff]   ;;  %v46_v6 = vpack.c.bf16 %v45_v5, %v45_v5 }
  0x29   :  { %88 = vmatpush1.bf16.msra.mxu0 %v348_v2  ;;  %vm83_vm0 = vcmask 261120   ;;  %v453_v7 = vmov 0.0   ;;  %v54_v9 = vshrl.u32 %v53_v8, 7  ;;  %v51_v11 = vld [vmem:[%s541_s2] sm:$0x3]  ;;  %v132_v13 = vand.u32 127, %v53_v8 }
  0x2a   :  { %89 = vmatprep.subr.bf16.mxu0 %v349_v3  ;;  %206 = vmatprep.mubr.f32.mxu1 %v453_v7  ;;  %vm138_vm2 = vcmask 64512   ;;  %s454_s2 = smov [#allocation7]  }
  0x2b   :  { %v55_v10 = vsub.s32 0, %v54_v9  ;;  %v59_v12 = vsub.s32 1, %v54_v9  ;;  %vm135_vm1 = vcmp.lt.s32.totalorder %v132_v13, 6  ;;  %s306_s15 = sshll.u32 %s454_s2, 4  ;;  %s307_s15 = int_to_ptr.vmem [resolvable:$true] %s306_s15 }
  0x2c   :  { %v335_v22 = vsel %vm135_vm1, 1.0, %v453_v7  ;;  %s396_s16 = scalar_lea.vmem %s307_s15, 256  ;;  %p401_p3 = scmp.lt.s32.totalorder %s307_s15, %s307_s15 }
  0x2d   :  { %90 = vmatpush1.bf16.msra.mxu0 %v351_v4  ;;  %v56_v14 = vrot.slane %v51_v11, %v55_v10  ;;  %v60_v15 = vrot.slane %v51_v11, %v59_v12  ;;  %p397_p2 = scmp.ne.s32.totalorder %s307_s15, %s396_s16  ;;  %p402_p4 = scmp.lt.s32.totalorder %s396_s16, %s396_s16 }
  0x2f   :  { %p403_p5 = por %p402_p4, %p401_p3 }
  0x30   :  { %334 = vmatmul.mubr.msk.bf16.vlgmr.msra.gmra.mrb[0].mxu0 %vm83_vm0, %v46_v6 }
  0x31   :  { %p404_p6 = pnand %p403_p5, %p397_p2 }
 0x103   :  { %v121_v16 = vpop.f32.mrb[0].mxu0 }
 0x104   :  { %v122_v17 = vadd.f32 %v121_v16, %v56_v14  ;;  %v123_v18 = vpop.f32.mrb[1].mxu0 }
 0x105   :  { %v124_v19 = vadd.f32 %v123_v18, %v60_v15  ;;  %v125_v20 = vpop.f32.mrb[2].mxu0 }
 0x106   :  { %128 = vst [vmem:[#allocation7] sm:$0xff] %v122_v17  ;;  %v126_v21 = vpop.f32.mrb[3].mxu0  ;;  %v213_v24 = vmul.f32 %v122_v17, %v122_v17 }
 0x107   :  { %129 = vst [vmem:[#allocation7 + $0x8] sm:$0xff] %v124_v19  ;;  %142 = vmatprep.subr.mxu1 %v124_v19  ;;  %v214_v23 = vmul.f32 %v124_v19, %v124_v19 }
 0x108   :  { %143 = vmatpush1.msra.mxu1 %v122_v17 }
 0x109   :  { %336 = vmatmul.mubr.msk.f32.vlgmr.msra.gmra.mrb[0].mxu1 %vm138_vm2, %v335_v22  ;;  %215 = vmatprep.subr.mxu1 %v214_v23 }
 0x10a   :  { %216 = vmatpush1.msra.mxu1 %v213_v24  ;;  %279 = vmatprep.mubr.f32.mxu1 %v453_v7 }
 0x10d   :  { %337 = vmatmul.mubr.msk.f32.vlgmr.msra.gmra.mrb[2].mxu1 %vm138_vm2, %v335_v22 }
 0x10e   :  { %407 = shalt.err (!%p404_p6)
}
 0x10f   :  { %s408_s19 = scalar_lea.hbm %s542_s3, 256 }
 0x110   :  { %p409_p7 = scmp.ne.s32.totalorder %s542_s3, %s408_s19  ;;  %p412_p8 = scmp.lt.u32.totalorder %s408_s19, %s542_s3 }
 0x112   :  { %p414_p9 = pnand %p412_p8, %p409_p7 }
 0x114   :  { %417 = shalt.err (!%p414_p9)
}
 0x115   :  { %309 = dma.vmem_to_hbm [thread:$0]  %s307_s15, 256, %s542_s3, [#allocation4]   ;;  %vm292_vm3 = vcmask 1040384   ;;  %vm295_vm4 = vcmask 1041408  }
 0x116   :  { %s455_s26 = smov [#allocation8]  }
 0x117   :  { %s316_s27 = sshll.u32 %s455_s26, 4  ;;  %s317_s27 = int_to_ptr.vmem [resolvable:$true] %s316_s27 }
 0x118   :  { %s418_s28 = scalar_lea.vmem %s317_s27, 256  ;;  %p423_p11 = scmp.lt.s32.totalorder %s317_s27, %s317_s27 }
 0x119   :  { %p419_p10 = scmp.ne.s32.totalorder %s317_s27, %s418_s28  ;;  %p424_p12 = scmp.lt.s32.totalorder %s418_s28, %s418_s28 }
 0x11b   :  { %p425_p13 = por %p424_p12, %p423_p11 }
 0x11d   :  { %p426_p0 = pnand %p425_p13, %p419_p10 }
 0x1dc   :  { %v208_v25 = vpop.f32.mrb[0].mxu1 }
 0x1dd   :  { %v210_v26 = vpop.f32.mrb[1].mxu1 }
 0x1e0   :  { %v281_v27 = vpop.f32.mrb[2].mxu1 }
 0x1e1   :  { %v288_v28 = vrot.slane %v281_v27, 7  ;;  %v283_v29 = vpop.f32.mrb[3].mxu1 }
 0x1e2   :  { %v289_v30 = vrot.slane %v283_v29, 7 }
 0x1e3   :  { %v293_v31 = vsel %vm292_vm3, %v208_v25, %v288_v28 }
 0x1e4   :  { %v294_v32 = vsel %vm292_vm3, %v210_v26, %v289_v30  ;;  %v296_v33 = vsel %vm295_vm4, %v293_v31, 0.0 }
 0x1e5   :  { %v297_v34 = vsel %vm295_vm4, %v294_v32, 0.0  ;;  %298 = vst [vmem:[#allocation8] sm:$0xff] %v296_v33 }
 0x1e6   :  { %299 = vst [vmem:[#allocation8 + $0x8] sm:$0xff] %v297_v34 }
 0x1e7   :  { %429 = shalt.err (!%p426_p0)
}
 0x1e8   :  { %s430_s30 = scalar_lea.hbm %s543_s4, 256 }
 0x1e9   :  { %p431_p1 = scmp.ne.s32.totalorder %s543_s4, %s430_s30  ;;  %p434_p2 = scmp.lt.u32.totalorder %s430_s30, %s543_s4 }
 0x1eb   :  { %p436_p3 = pnand %p434_p2, %p431_p1 }
 0x1ed   :  { %439 = shalt.err (!%p436_p3)
}
 0x1ee   :  { %319 = dma.vmem_to_hbm [thread:$0]  %s317_s27, 256, %s543_s4, [#allocation9]  }
 0x1ef   :  { %444 = dma.done.wait [#allocation4], 256  }
 0x1f0   :  { %445 = vsyncadd [#allocation4], 4294967040 }
 0x1f1   :  { %446 = dma.done.wait [#allocation9], 256  }
 0x1f2   :  { %447 = vsyncadd [#allocation9], 4294967040 }
 0x1f3   :  { %326 = vsyncpa [#allocation3], 1 }
 0x1f4   :  { %327 = vsyncpa [#allocation6], 1 }
 0x1f5   :  { %328 = vsyncpa [#allocation4], 1 }
 0x1f6   :  { %329 = vsyncpa [#allocation9], 1 }

</bundles_post_ra>
